<compile_context>
chip_gen: v7x
topology: tpu7x:2x2x1
jax: 0.10.0
libtpu: 0.0.40
codegen_flags: <defaults>
</compile_context>

<pallas_src>
import functools

import jax
import jax.numpy as jnp
from jax import lax
from jax.experimental import pallas as pl
from jax.experimental.pallas import tpu as pltpu


# ----------------------------------------------------------------------------
# Fused forward kernel: residual Linear + num_layers AGNNConv layers + relu.
# ----------------------------------------------------------------------------
def _agnn_model_kernel(betas_ref, x_ref, adj_ref, wlin_ref, blin_ref, out_ref,
                       *, num_layers):
    x0 = x_ref[...]                                   # (N, CP) f32, lane-dense CP

    # Additive attention-mask bias, computed ONCE (adj arrives as int8).
    # adj[i, j] != 0  <=>  edge j -> i (self-loops included).
    edge = adj_ref[...].astype(jnp.float32)           # (N, N)
    bias = jnp.where(edge > 0.0, 0.0, -1e30)

    # Residual branch: lin(x) = x0 @ W^T + b (bf16 MXU operands, f32 accumulate;
    # weight pre-transposed and pre-padded host-side).
    res = jnp.dot(x0.astype(jnp.bfloat16),
                  wlin_ref[...].astype(jnp.bfloat16),
                  preferred_element_type=jnp.float32) + blin_ref[...]

    h = x0
    for layer in range(num_layers):                   # static unroll (tiny layer count)
        beta = betas_ref[layer]                       # scalar from SMEM

        # Row-wise L2 normalization (F.normalize semantics, eps-guarded);
        # padded feature columns are zero so they do not perturb the norm.
        sq = jnp.sum(h * h, axis=-1, keepdims=True)
        hn = (h * lax.rsqrt(jnp.maximum(sq, 1e-24))).astype(jnp.bfloat16)

        # Cosine-similarity logits sim[i, j] = <hn[i], hn[j]> (bf16 MXU, no
        # explicit transpose materialized), plus the hoisted additive mask.
        sim = lax.dot_general(hn, hn, (((1,), (1,)), ((), ())),
                              preferred_element_type=jnp.float32)
        logits = beta * sim + bias

        # Masked softmax over incoming neighbors.  Non-edge entries are ~-1e30
        # after the bias, so exp underflows to exactly 0 — no second select.
        m = jnp.max(logits, axis=-1, keepdims=True)
        e = jnp.exp(logits - m)                       # f32 exp (portable to v5e)
        denom = jnp.maximum(jnp.sum(e, axis=-1, keepdims=True), 1e-30)

        # Aggregate the original (unnormalized) features with the raw exp
        # weights on the MXU, then normalize the (N, CP) result — avoids the
        # O(N^2) VPU scale of the attention matrix (flash-attention style).
        agg = jnp.dot(e.astype(jnp.bfloat16), h.astype(jnp.bfloat16),
                      preferred_element_type=jnp.float32)
        h = agg * pl.reciprocal(denom, approx=False)  # exact 1/x; denom is only (N,1)
        if layer == 0:
            h = jnp.maximum(h, 0.0)                   # relu after conv1

    out_ref[...] = jnp.maximum(h + res, 0.0)


def agnn_model_forward(x, adj_i8, betas, wlin_t, blin):
    """Fused AGNNModel forward (inference).

    x:      (N, C)  f32   node features, C = in_channels = out_channels
    adj_i8: (N, N)  int8  adj[i, j] = 1 iff edge j -> i (self-loops included)
    betas:  (L,)    f32   per-layer AGNNConv beta scalars
    wlin_t: (C, C)  f32   Linear weight, pre-transposed for x @ W^T
    blin:   (1, C)  f32   Linear bias
    Returns (N, C) f32.
    """
    N, C = x.shape
    assert wlin_t.shape == (C, C) and adj_i8.shape == (N, N)
    num_layers = int(betas.shape[0])

    # Lane-dense feature dim: zero-pad C up to a multiple of 128.
    cp = ((C + 127) // 128) * 128
    pad = cp - C
    x_p = jnp.pad(x, ((0, 0), (0, pad)))
    w_p = jnp.pad(wlin_t, ((0, pad), (0, pad)))
    b_p = jnp.pad(blin, ((0, 0), (0, pad)))

    kernel = functools.partial(_agnn_model_kernel, num_layers=num_layers)
    vmem = pltpu.MemorySpace.VMEM
    smem = pltpu.MemorySpace.SMEM
    out_p = pl.pallas_call(
        kernel,
        out_shape=jax.ShapeDtypeStruct((N, cp), jnp.float32),
        in_specs=[
            pl.BlockSpec(memory_space=smem),   # betas (per-layer scalars)
            pl.BlockSpec(memory_space=vmem),   # x (padded)
            pl.BlockSpec(memory_space=vmem),   # adj (int8)
            pl.BlockSpec(memory_space=vmem),   # Wlin^T (padded)
            pl.BlockSpec(memory_space=vmem),   # blin (padded)
        ],
        out_specs=pl.BlockSpec(memory_space=vmem),
    )(betas, x_p, adj_i8, w_p, b_p)
    return out_p[:, :C]


def build_adj(edge_index, num_nodes):
    """Dense int8 adjacency with self-loops: adj[dst, src] = 1 for edge src->dst."""
    src, dst = edge_index[0], edge_index[1]
    adj = jnp.zeros((num_nodes, num_nodes), jnp.int8)
    adj = adj.at[dst, src].set(1)                     # edge src -> dst
    idx = jnp.arange(num_nodes)
    adj = adj.at[idx, idx].set(1)                     # add self-loops (PyG default)
    return adj


if __name__ == "__main__":
    # Module hyperparameters (small; AGNNConv preserves feature dim, so the
    # residual add forces in_channels == out_channels; hidden_channels is
    # mathematically unused by PyG's AGNNConv).
    N = 16
    IN_CH = 16
    OUT_CH = 16
    HID = 32
    NUM_LAYERS = 3     # conv1 + (NUM_LAYERS - 2) mid convs + conv_out

    key = jax.random.PRNGKey(0)
    k_x, k_w, k_b, k_beta = jax.random.split(key, 4)

    x = jax.random.normal(k_x, (N, IN_CH), dtype=jnp.float32)
    wlin_t = (0.1 * jax.random.normal(k_w, (IN_CH, OUT_CH))).astype(jnp.float32)
    blin = (0.1 * jax.random.normal(k_b, (1, OUT_CH))).astype(jnp.float32)
    # PyG initializes beta to 1.0; perturb slightly so each layer is distinct.
    betas = (1.0 + 0.1 * jax.random.normal(k_beta, (NUM_LAYERS,))).astype(jnp.float32)

    # Deterministic edge_index (2, E): bidirectional ring + a few chords.
    ring_src = list(range(N)) + [(i + 1) % N for i in range(N)]
    ring_dst = [(i + 1) % N for i in range(N)] + list(range(N))
    chord_src = [0, 8, 3, 11]
    chord_dst = [8, 0, 11, 3]
    edge_index = jnp.array([ring_src + chord_src, ring_dst + chord_dst],
                           dtype=jnp.int32)
    adj = build_adj(edge_index, N)

    out = agnn_model_forward(x, adj, betas, wlin_t, blin)
    out = jax.block_until_ready(out)
    assert out.shape == (N, OUT_CH), out.shape
    assert bool(jnp.all(jnp.isfinite(out)))
    print("KERNEL_OK")
</pallas_src>

<mosaic_0001>
module attributes {stable_mosaic.version = 11 : i64} {
  func.func @_agnn_model_kernel(%arg0: memref<3xf32, #tpu.memory_space<smem>>, %arg1: memref<16x128xf32, #tpu.memory_space<vmem>>, %arg2: memref<16x16xi8, #tpu.memory_space<vmem>>, %arg3: memref<128x128xf32, #tpu.memory_space<vmem>>, %arg4: memref<1x128xf32, #tpu.memory_space<vmem>>, %arg5: memref<16x128xf32, #tpu.memory_space<vmem>>) attributes {dimension_semantics = [], scalar_prefetch = 0 : i64, scratch_operands = 0 : i64, tpu.core_type = #tpu.core_type<tc>} {
    %c0 = arith.constant 0 : index
    %c0_0 = arith.constant 0 : index
    %0 = vector.load %arg1[%c0, %c0_0] : memref<16x128xf32, #tpu.memory_space<vmem>>, vector<16x128xf32>
    %c0_1 = arith.constant 0 : index
    %c0_2 = arith.constant 0 : index
    %1 = vector.load %arg2[%c0_1, %c0_2] : memref<16x16xi8, #tpu.memory_space<vmem>>, vector<16x16xi8>
    %2 = arith.sitofp %1 : vector<16x16xi8> to vector<16x16xf32>
    %cst = arith.constant 0.000000e+00 : f32
    %3 = vector.broadcast %cst : f32 to vector<16x16xf32>
    %4 = arith.cmpf ogt, %2, %3 : vector<16x16xf32>
    %cst_3 = arith.constant 0.000000e+00 : f32
    %cst_4 = arith.constant -1.000000e+30 : f32
    %5 = vector.broadcast %cst_3 : f32 to vector<16x16xf32>
    %6 = vector.broadcast %cst_4 : f32 to vector<16x16xf32>
    %7 = arith.select %4, %5, %6 : vector<16x16xi1>, vector<16x16xf32>
    %8 = arith.truncf %0 : vector<16x128xf32> to vector<16x128xbf16>
    %c0_5 = arith.constant 0 : index
    %c0_6 = arith.constant 0 : index
    %9 = vector.load %arg3[%c0_5, %c0_6] : memref<128x128xf32, #tpu.memory_space<vmem>>, vector<128x128xf32>
    %10 = arith.truncf %9 : vector<128x128xf32> to vector<128x128xbf16>
    %cst_7 = arith.constant dense<0.000000e+00> : vector<16x128xf32>
    %11 = tpu.matmul %8, %10, %cst_7 {dimension_numbers = #tpu.dot_dimension_numbers<[1], [0], [0], [1], [0, 0, 1, 1], [], []>} : vector<16x128xbf16>, vector<128x128xbf16>, vector<16x128xf32> -> vector<16x128xf32>
    %c0_8 = arith.constant 0 : index
    %c0_9 = arith.constant 0 : index
    %12 = vector.load %arg4[%c0_8, %c0_9] : memref<1x128xf32, #tpu.memory_space<vmem>>, vector<1x128xf32>
    %13 = vector.broadcast %12 : vector<1x128xf32> to vector<16x128xf32>
    %14 = arith.addf %11, %13 : vector<16x128xf32>
    %c0_10 = arith.constant 0 : index
    %15 = memref.load %arg0[%c0_10] : memref<3xf32, #tpu.memory_space<smem>>
    %16 = arith.mulf %0, %0 : vector<16x128xf32>
    %cst_11 = arith.constant dense<0.000000e+00> : vector<16xf32>
    %17 = vector.multi_reduction <add>, %16, %cst_11 [1] : vector<16x128xf32> to vector<16xf32>
    %18 = vector.shape_cast %17 : vector<16xf32> to vector<16x1xf32>
    %cst_12 = arith.constant 1.000000e-24 : f32
    %19 = vector.broadcast %cst_12 : f32 to vector<16x1xf32>
    %20 = arith.maximumf %18, %19 : vector<16x1xf32>
    %21 = math.rsqrt %20 : vector<16x1xf32>
    %22 = vector.broadcast %21 : vector<16x1xf32> to vector<16x128xf32>
    %23 = arith.mulf %0, %22 : vector<16x128xf32>
    %24 = arith.truncf %23 : vector<16x128xf32> to vector<16x128xbf16>
    %cst_13 = arith.constant dense<0.000000e+00> : vector<16x16xf32>
    %25 = tpu.matmul %24, %24, %cst_13 {dimension_numbers = #tpu.dot_dimension_numbers<[1], [1], [0], [0], [0, 0, 1, 0], [], []>} : vector<16x128xbf16>, vector<16x128xbf16>, vector<16x16xf32> -> vector<16x16xf32>
    %26 = vector.broadcast %15 : f32 to vector<16x16xf32>
    %27 = arith.mulf %26, %25 : vector<16x16xf32>
    %28 = arith.addf %27, %7 : vector<16x16xf32>
    %cst_14 = arith.constant dense<0xFF800000> : vector<16xf32>
    %29 = vector.multi_reduction <maximumf>, %28, %cst_14 [1] : vector<16x16xf32> to vector<16xf32>
    %30 = vector.shape_cast %29 : vector<16xf32> to vector<16x1xf32>
    %31 = vector.broadcast %30 : vector<16x1xf32> to vector<16x16xf32>
    %32 = arith.subf %28, %31 : vector<16x16xf32>
    %33 = math.exp %32 : vector<16x16xf32>
    %cst_15 = arith.constant dense<0.000000e+00> : vector<16xf32>
    %34 = vector.multi_reduction <add>, %33, %cst_15 [1] : vector<16x16xf32> to vector<16xf32>
    %35 = vector.shape_cast %34 : vector<16xf32> to vector<16x1xf32>
    %cst_16 = arith.constant 1.000000e-30 : f32
    %36 = vector.broadcast %cst_16 : f32 to vector<16x1xf32>
    %37 = arith.maximumf %35, %36 : vector<16x1xf32>
    %38 = arith.truncf %33 : vector<16x16xf32> to vector<16x16xbf16>
    %39 = arith.truncf %0 : vector<16x128xf32> to vector<16x128xbf16>
    %cst_17 = arith.constant dense<0.000000e+00> : vector<16x128xf32>
    %40 = tpu.matmul %38, %39, %cst_17 {dimension_numbers = #tpu.dot_dimension_numbers<[1], [0], [0], [1], [0, 0, 1, 1], [], []>} : vector<16x16xbf16>, vector<16x128xbf16>, vector<16x128xf32> -> vector<16x128xf32>
    %41 = tpu.reciprocal %37 : vector<16x1xf32> -> vector<16x1xf32>
    %42 = vector.broadcast %41 : vector<16x1xf32> to vector<16x128xf32>
    %43 = arith.mulf %40, %42 : vector<16x128xf32>
    %cst_18 = arith.constant 0.000000e+00 : f32
    %44 = vector.broadcast %cst_18 : f32 to vector<16x128xf32>
    %45 = arith.maximumf %43, %44 : vector<16x128xf32>
    %c1 = arith.constant 1 : index
    %46 = memref.load %arg0[%c1] : memref<3xf32, #tpu.memory_space<smem>>
    %47 = arith.mulf %45, %45 : vector<16x128xf32>
    %cst_19 = arith.constant dense<0.000000e+00> : vector<16xf32>
    %48 = vector.multi_reduction <add>, %47, %cst_19 [1] : vector<16x128xf32> to vector<16xf32>
    %49 = vector.shape_cast %48 : vector<16xf32> to vector<16x1xf32>
    %cst_20 = arith.constant 1.000000e-24 : f32
    %50 = vector.broadcast %cst_20 : f32 to vector<16x1xf32>
    %51 = arith.maximumf %49, %50 : vector<16x1xf32>
    %52 = math.rsqrt %51 : vector<16x1xf32>
    %53 = vector.broadcast %52 : vector<16x1xf32> to vector<16x128xf32>
    %54 = arith.mulf %45, %53 : vector<16x128xf32>
    %55 = arith.truncf %54 : vector<16x128xf32> to vector<16x128xbf16>
    %cst_21 = arith.constant dense<0.000000e+00> : vector<16x16xf32>
    %56 = tpu.matmul %55, %55, %cst_21 {dimension_numbers = #tpu.dot_dimension_numbers<[1], [1], [0], [0], [0, 0, 1, 0], [], []>} : vector<16x128xbf16>, vector<16x128xbf16>, vector<16x16xf32> -> vector<16x16xf32>
    %57 = vector.broadcast %46 : f32 to vector<16x16xf32>
    %58 = arith.mulf %57, %56 : vector<16x16xf32>
    %59 = arith.addf %58, %7 : vector<16x16xf32>
    %cst_22 = arith.constant dense<0xFF800000> : vector<16xf32>
    %60 = vector.multi_reduction <maximumf>, %59, %cst_22 [1] : vector<16x16xf32> to vector<16xf32>
    %61 = vector.shape_cast %60 : vector<16xf32> to vector<16x1xf32>
    %62 = vector.broadcast %61 : vector<16x1xf32> to vector<16x16xf32>
    %63 = arith.subf %59, %62 : vector<16x16xf32>
    %64 = math.exp %63 : vector<16x16xf32>
    %cst_23 = arith.constant dense<0.000000e+00> : vector<16xf32>
    %65 = vector.multi_reduction <add>, %64, %cst_23 [1] : vector<16x16xf32> to vector<16xf32>
    %66 = vector.shape_cast %65 : vector<16xf32> to vector<16x1xf32>
    %cst_24 = arith.constant 1.000000e-30 : f32
    %67 = vector.broadcast %cst_24 : f32 to vector<16x1xf32>
    %68 = arith.maximumf %66, %67 : vector<16x1xf32>
    %69 = arith.truncf %64 : vector<16x16xf32> to vector<16x16xbf16>
    %70 = arith.truncf %45 : vector<16x128xf32> to vector<16x128xbf16>
    %cst_25 = arith.constant dense<0.000000e+00> : vector<16x128xf32>
    %71 = tpu.matmul %69, %70, %cst_25 {dimension_numbers = #tpu.dot_dimension_numbers<[1], [0], [0], [1], [0, 0, 1, 1], [], []>} : vector<16x16xbf16>, vector<16x128xbf16>, vector<16x128xf32> -> vector<16x128xf32>
    %72 = tpu.reciprocal %68 : vector<16x1xf32> -> vector<16x1xf32>
    %73 = vector.broadcast %72 : vector<16x1xf32> to vector<16x128xf32>
    %74 = arith.mulf %71, %73 : vector<16x128xf32>
    %c2 = arith.constant 2 : index
    %75 = memref.load %arg0[%c2] : memref<3xf32, #tpu.memory_space<smem>>
    %76 = arith.mulf %74, %74 : vector<16x128xf32>
    %cst_26 = arith.constant dense<0.000000e+00> : vector<16xf32>
    %77 = vector.multi_reduction <add>, %76, %cst_26 [1] : vector<16x128xf32> to vector<16xf32>
    %78 = vector.shape_cast %77 : vector<16xf32> to vector<16x1xf32>
    %cst_27 = arith.constant 1.000000e-24 : f32
    %79 = vector.broadcast %cst_27 : f32 to vector<16x1xf32>
    %80 = arith.maximumf %78, %79 : vector<16x1xf32>
    %81 = math.rsqrt %80 : vector<16x1xf32>
    %82 = vector.broadcast %81 : vector<16x1xf32> to vector<16x128xf32>
    %83 = arith.mulf %74, %82 : vector<16x128xf32>
    %84 = arith.truncf %83 : vector<16x128xf32> to vector<16x128xbf16>
    %cst_28 = arith.constant dense<0.000000e+00> : vector<16x16xf32>
    %85 = tpu.matmul %84, %84, %cst_28 {dimension_numbers = #tpu.dot_dimension_numbers<[1], [1], [0], [0], [0, 0, 1, 0], [], []>} : vector<16x128xbf16>, vector<16x128xbf16>, vector<16x16xf32> -> vector<16x16xf32>
    %86 = vector.broadcast %75 : f32 to vector<16x16xf32>
    %87 = arith.mulf %86, %85 : vector<16x16xf32>
    %88 = arith.addf %87, %7 : vector<16x16xf32>
    %cst_29 = arith.constant dense<0xFF800000> : vector<16xf32>
    %89 = vector.multi_reduction <maximumf>, %88, %cst_29 [1] : vector<16x16xf32> to vector<16xf32>
    %90 = vector.shape_cast %89 : vector<16xf32> to vector<16x1xf32>
    %91 = vector.broadcast %90 : vector<16x1xf32> to vector<16x16xf32>
    %92 = arith.subf %88, %91 : vector<16x16xf32>
    %93 = math.exp %92 : vector<16x16xf32>
    %cst_30 = arith.constant dense<0.000000e+00> : vector<16xf32>
    %94 = vector.multi_reduction <add>, %93, %cst_30 [1] : vector<16x16xf32> to vector<16xf32>
    %95 = vector.shape_cast %94 : vector<16xf32> to vector<16x1xf32>
    %cst_31 = arith.constant 1.000000e-30 : f32
    %96 = vector.broadcast %cst_31 : f32 to vector<16x1xf32>
    %97 = arith.maximumf %95, %96 : vector<16x1xf32>
    %98 = arith.truncf %93 : vector<16x16xf32> to vector<16x16xbf16>
    %99 = arith.truncf %74 : vector<16x128xf32> to vector<16x128xbf16>
    %cst_32 = arith.constant dense<0.000000e+00> : vector<16x128xf32>
    %100 = tpu.matmul %98, %99, %cst_32 {dimension_numbers = #tpu.dot_dimension_numbers<[1], [0], [0], [1], [0, 0, 1, 1], [], []>} : vector<16x16xbf16>, vector<16x128xbf16>, vector<16x128xf32> -> vector<16x128xf32>
    %101 = tpu.reciprocal %97 : vector<16x1xf32> -> vector<16x1xf32>
    %102 = vector.broadcast %101 : vector<16x1xf32> to vector<16x128xf32>
    %103 = arith.mulf %100, %102 : vector<16x128xf32>
    %104 = arith.addf %103, %14 : vector<16x128xf32>
    %cst_33 = arith.constant 0.000000e+00 : f32
    %105 = vector.broadcast %cst_33 : f32 to vector<16x128xf32>
    %106 = arith.maximumf %104, %105 : vector<16x128xf32>
    %c0_34 = arith.constant 0 : index
    %c0_35 = arith.constant 0 : index
    %107 = vector.load %arg5[%c0_34, %c0_35] : memref<16x128xf32, #tpu.memory_space<vmem>>, vector<16x128xf32>
    tpu.vector_store %arg5[%c0_34, %c0_35], %106 {strides = array<i32>} : memref<16x128xf32, #tpu.memory_space<vmem>>, vector<16x128xf32>,
    return
  }
}

</mosaic_0001>

<bundles_post_ra>
// kernel: tpu_custom_call.1
= control target key start
LH: loop header
LB: loop body
LE: loop exit
PB: predicated region body
PF: predicated region fallthrough
CT: control target
= control target key end

     0   :  { %10 = vsyncpa [#allocation5], 0  ;;  %s938_s0 = inlined_call_operand.hbm [shape: f32[3], index: 0, kind: input, shape index: {}]   ;;  %s939_s1 = inlined_call_operand.hbm [shape: f32[16,128], index: 1, kind: input, shape index: {}]   ;;  %s940_s2 = inlined_call_operand.vmem [shape: s8[16,16], index: 2, kind: input, shape index: {}]   ;;  %s941_s3 = inlined_call_operand.hbm [shape: f32[128,128], index: 3, kind: input, shape index: {}]   ;;  %s942_s4 = inlined_call_operand.vmem [shape: f32[1,128], index: 4, kind: input, shape index: {}]   ;;  %s943_s5 = inlined_call_operand.hbm [shape: f32[16,128], index: 5, kind: output, shape index: {}]  }
   0x1   :  { %11 = vsyncpa [#allocation3], 0 }
   0x2   :  { %12 = vsyncpa [#allocation8], 0 }
   0x3   :  { %13 = vsyncpa [#allocation4], 0  ;;  %s695_s20 = scalar_lea.hbm %s938_s0, 16 }
   0x4   :  { %p696_p0 = scmp.ne.s32.totalorder %s938_s0, %s695_s20  ;;  %p699_p1 = scmp.lt.u32.totalorder %s695_s20, %s938_s0 }
   0x6   :  { %p701_p2 = pnand %p699_p1, %p696_p0 }
   0x8   :  { %704 = shalt.err (!%p701_p2)
}
   0x9   :  { %s779_s25 = smov [#allocation2]   ;;  %s780_s28 = smov [#allocation6]  }
   0xa   :  { %21 = dma.hbm_to_smem %s938_s0, 16, %s779_s25, [#allocation5]  }
   0xb   :  { %s27_s29 = sshll.u32 %s780_s28, 4  ;;  %s705_s7 = scalar_lea.hbm %s939_s1, 256  ;;  %s28_s29 = int_to_ptr.vmem [resolvable:$true] %s27_s29 }
   0xc   :  { %p706_p3 = scmp.ne.s32.totalorder %s939_s1, %s705_s7  ;;  %p709_p4 = scmp.lt.u32.totalorder %s705_s7, %s939_s1 }
   0xe   :  { %p711_p5 = pnand %p709_p4, %p706_p3 }
  0x10   :  { %714 = shalt.err (!%p711_p5)
}
  0x11   :  { %s715_s12 = scalar_lea.vmem %s28_s29, 256  ;;  %p720_p7 = scmp.lt.s32.totalorder %s28_s29, %s28_s29 }
  0x12   :  { %p716_p6 = scmp.ne.s32.totalorder %s28_s29, %s715_s12  ;;  %p721_p8 = scmp.lt.s32.totalorder %s715_s12, %s715_s12 }
  0x14   :  { %p722_p9 = por %p721_p8, %p720_p7 }
  0x16   :  { %p723_p10 = pnand %p722_p9, %p716_p6 }
  0x18   :  { %726 = shalt.err (!%p723_p10)
}
  0x19   :  { %s781_s0 = smov 128   ;;  %s782_s13 = smov 8  }
  0x1a   :  { %33 = dma.hbm_to_vmem [thread:$0]  %s939_s1, 256, %s28_s29, [#allocation3], %s781_s0, %s781_s0, %s782_s13  }
  0x1b   :  { %s783_s16 = smov [#allocation7]   ;;  %s727_s20 = scalar_lea.hbm %s941_s3, 2048 }
  0x1c   :  { %s41_s17 = sshll.u32 %s783_s16, 4  ;;  %p728_p11 = scmp.ne.s32.totalorder %s941_s3, %s727_s20  ;;  %s42_s17 = int_to_ptr.vmem [resolvable:$true] %s41_s17 }
  0x1d   :  { %p731_p12 = scmp.lt.u32.totalorder %s727_s20, %s941_s3 }
  0x1f   :  { %p733_p13 = pnand %p731_p12, %p728_p11 }
  0x21   :  { %736 = shalt.err (!%p733_p13)
}
  0x22   :  { %s737_s25 = scalar_lea.vmem %s42_s17, 2048  ;;  %p742_p1 = scmp.lt.s32.totalorder %s42_s17, %s42_s17 }
  0x23   :  { %p738_p0 = scmp.ne.s32.totalorder %s42_s17, %s737_s25  ;;  %p743_p2 = scmp.lt.s32.totalorder %s737_s25, %s737_s25 }
  0x25   :  { %p744_p3 = por %p743_p2, %p742_p1 }
  0x27   :  { %p745_p4 = pnand %p744_p3, %p738_p0 }
  0x29   :  { %748 = shalt.err (!%p745_p4)
}
  0x2a   :  { %47 = dma.hbm_to_vmem [thread:$0]  %s941_s3, 2048, %s42_s17, [#allocation8], %s781_s0, %s781_s0, %s782_s13  }
  0x2b   :  { %771 = dma.done.wait [#allocation5], 16  }
  0x2c   :  { %772 = vsyncadd [#allocation5], 4294967280 }
  0x2d   :  { %773 = dma.done.wait [#allocation3], 256  }
  0x2e   :  { %774 = vsyncadd [#allocation3], 4294967040 }
  0x2f   :  { %775 = dma.done.wait [#allocation8], 2048  }
  0x30   :  { %776 = vsyncadd [#allocation8], 4294965248 }
  0x31   :  { %59 = sfence }
  0x32   :  { %v61_v0 = vld [vmem:[#allocation6] sm:$0xff]  ;;  %v62_v1 = vld [vmem:[#allocation6 + $0x8] sm:$0xff]  ;;  %v784_v4 = vmov 0.0   ;;  %vm785_vm0 = vmmov 0   ;;  %v570_v15 = vld [vmem:[%s940_s2] sm:$0xf]  }
  0x33   :  { %v147_v2 = vmul.f32 %v61_v0, %v61_v0  ;;  %v148_v3 = vmul.f32 %v62_v1, %v62_v1  ;;  %614 = vmatprep.subr.bf16.mxu1 %v784_v4  ;;  %594 = vmatprep.subr.bf16.mxu0 %v784_v4  ;;  %v867_v14 = vpack.c.bf16 %v62_v1, %v61_v0  ;;  %v571_v16 = vunpack.c.0.s8 %v570_v15  ;;  %s146_s28 = sld [smem:[#allocation2]]  ;;  %s565_s2 = sld [smem:[#allocation2 + $0x1]] }
  0x34   :  { %616 = vmatprep.mubr.msk.bf16.mxu1 %vm785_vm0, %v784_v4  ;;  %610 = vmatprep.mubr.msk.bf16.mxu0 %vm785_vm0, %v784_v4  ;;  %v572_v17 = vunpack.c.1.s8 %v570_v15  ;;  %v786_v22 = vmov -1e+30   ;;  %vm206_vm3 = vcmask 130048   ;;  %s567_s29 = sld [smem:[#allocation2 + $0x2]]  ;;  %s787_s7 = smov [#allocation9]  }
  0x35   :  { %149 = vadd.xlane.f32.xlu0 %v147_v2  ;;  %v67_v18 = vcvt.s32.f32 %v571_v16  ;;  %s549_s8 = sshll.u32 %s787_s7, 4  ;;  %s550_s8 = int_to_ptr.vmem [resolvable:$true] %s549_s8 }
  0x36   :  { %v68_v19 = vcvt.s32.f32 %v572_v17  ;;  %p754_p6 = scmp.lt.s32.totalorder %s550_s8, %s550_s8 }
  0x37   :  { %vm69_vm1 = vcmp.gt.f32.partialorder %v67_v18, 0.0 }
  0x38   :  { %vm70_vm2 = vcmp.gt.f32.partialorder %v68_v19, 0.0  ;;  %v876_v23 = vsel %vm69_vm1, 0.0, %v786_v22 }
  0x39   :  { %151 = vadd.xlane.f32.xlu0 %v148_v3  ;;  %v201_v20 = vstv %s146_s28  ;;  %v878_v27 = vsel %vm70_vm2, 0.0, %v786_v22 }
  0xc2   :  { %v150_v5 = vpop.xlane.xlu0 %149 }
  0xc3   :  { %v153_v6 = vmax.f32 %v150_v5, 1e-24 }
  0xc5   :  { %659 = vrsqrt.f32 %v153_v6 }
  0xc6   :  { %v152_v7 = vpop.xlane.xlu0 %151 }
  0xc7   :  { %v154_v8 = vmax.f32 %v152_v7, 1e-24 }
  0xc9   :  { %661 = vrsqrt.f32 %v154_v8  ;;  %v333_v8 = vstv %s565_s2 }
  0xcf   :  { %v660_v9 = vpop.eup %659 }
  0xd0   :  { %v157_v11 = vmul.f32 %v660_v9, %v61_v0 }
  0xd3   :  { %v662_v10 = vpop.eup %661 }
  0xd4   :  { %v158_v12 = vmul.f32 %v662_v10, %v62_v1 }
  0xd6   :  { %v159_v13 = vpack.c.bf16 %v158_v12, %v157_v11 }
  0xd8   :  { %615 = vmatpush3.bf16.xpose.msra.mxu1 %v159_v13 }
  0xd9   :  { %620 = vmatprep.subr.bf16.mxu1 %v784_v4 }
  0xdf   :  { %617 = vmatmul.mubr.bf16.vlgmr.msra.gmra.mrb[0].mxu1 %v159_v13 }
  0xe0   :  { %621 = vmatpush3.bf16.msra.mxu1 %v867_v14  ;;  %622 = vmatprep.mubr.msk.bf16.mxu1 %vm785_vm0, %v784_v4 }
  0xe1   :  { %626 = vmatprep.subr.bf16.mxu1 %v784_v4 }
 0x1b2   :  { %v194_v21 = vpop.f32.mrb[0].mxu1 }
 0x1b3   :  { %v202_v24 = vmul.f32 %v201_v20, %v194_v21  ;;  %v618_v25 = vpop.f32.mrb[1].mxu1 }
 0x1b4   :  { %v197_v26 = vpop.f32.mrb[2].mxu1 }
 0x1b5   :  { %v203_v28 = vmul.f32 %v201_v20, %v197_v26  ;;  %v619_v29 = vpop.f32.mrb[3].mxu1  ;;  %v204_v30 = vadd.f32 %v202_v24, %v876_v23 }
 0x1b7   :  { %v207_v31 = vsel %vm206_vm3, %v204_v30, -inf  ;;  %v205_v32 = vadd.f32 %v203_v28, %v878_v27 }
 0x1b8   :  { %208 = vmax.xlane.f32.xlu1 %v207_v31 }
 0x1b9   :  { %v210_v33 = vsel %vm206_vm3, %v205_v32, -inf }
 0x1bc   :  { %211 = vmax.xlane.f32.xlu1 %v210_v33  ;;  %v74_v33 = vld [vmem:[#allocation7] sm:$0xff] }
 0x245   :  { %v209_v34 = vpop.xlane.xlu1 %208 }
 0x246   :  { %v213_v35 = vsub.f32 %v204_v30, %v209_v34  ;;  %v75_v34 = vld [vmem:[#allocation7 + $0x8] sm:$0xff] }
 0x248   :  { %v215_v36 = vmul.f32 1.442695, %v213_v35  ;;  %v76_v35 = vld [vmem:[#allocation7 + $0x10] sm:$0xff] }
 0x249   :  { %v212_v37 = vpop.xlane.xlu1 %211 }
 0x24a   :  { %663 = vpow2.f32 %v215_v36  ;;  %v214_v38 = vsub.f32 %v205_v32, %v212_v37  ;;  %v90_v36 = vpack.c.bf16 %v75_v34, %v74_v33  ;;  %v77_v37 = vld [vmem:[#allocation7 + $0x18] sm:$0xff] }
 0x24c   :  { %v217_v39 = vmul.f32 1.442695, %v214_v38  ;;  %595 = vmatpush3.bf16.msra.mxu0 %v90_v36  ;;  %v91_v38 = vpack.c.bf16 %v77_v37, %v76_v35 }
 0x24d   :  { %596 = vmatprep.subr.bf16.mxu0 %v784_v4 }
 0x24e   :  { %665 = vpow2.f32 %v217_v39  ;;  %v78_v39 = vld [vmem:[#allocation7 + $0x20] sm:$0xff] }
 0x250   :  { %597 = vmatpush3.bf16.msra.mxu0 %v91_v38 }
 0x251   :  { %598 = vmatprep.subr.bf16.mxu0 %v784_v4 }
 0x254   :  { %v664_v40 = vpop.eup %663 }
 0x255   :  { %v219_v41 = vsel %vm206_vm3, %v664_v40, 0.0 }
 0x256   :  { %220 = vadd.xlane.f32.xlu0 %v219_v41 }
 0x258   :  { %v666_v42 = vpop.eup %665 }
 0x259   :  { %v222_v43 = vsel %vm206_vm3, %v666_v42, 0.0  ;;  %v227_v44 = vpack.c.bf16 %v666_v42, %v664_v40  ;;  %v79_v40 = vld [vmem:[#allocation7 + $0x28] sm:$0xff]  ;;  %v80_v42 = vld [vmem:[#allocation7 + $0x30] sm:$0xff] }
 0x25a   :  { %223 = vadd.xlane.f32.xlu1 %v222_v43  ;;  %v92_v41 = vpack.c.bf16 %v79_v40, %v78_v39  ;;  %v81_v43 = vld [vmem:[#allocation7 + $0x38] sm:$0xff] }
 0x25b   :  { %623 = vmatmul.mubr.msk.bf16.vlgmr.msra.gmra.mrb[4].mxu1 %vm206_vm3, %v227_v44  ;;  %v93_v44 = vpack.c.bf16 %v81_v43, %v80_v42 }
 0x25c   :  { %628 = vmatprep.mubr.msk.bf16.mxu1 %vm785_vm0, %v784_v4  ;;  %599 = vmatpush3.bf16.msra.mxu0 %v92_v41 }
 0x25d   :  { %600 = vmatprep.subr.bf16.mxu0 %v784_v4 }
 0x260   :  { %601 = vmatpush3.bf16.msra.mxu0 %v93_v44 }
 0x261   :  { %602 = vmatprep.subr.bf16.mxu0 %v784_v4 }
 0x2e3   :  { %v221_v45 = vpop.xlane.xlu0 %220 }
 0x2e4   :  { %v225_v47 = vmax.f32 %v221_v45, 1e-30  ;;  %v82_v45 = vld [vmem:[#allocation7 + $0x40] sm:$0xff] }
 0x2e6   :  { %667 = vrcp.f32 %v225_v47 }
 0x2e7   :  { %v224_v46 = vpop.xlane.xlu1 %223 }
 0x2e8   :  { %v226_v48 = vmax.f32 %v224_v46, 1e-30  ;;  %v83_v46 = vld [vmem:[#allocation7 + $0x48] sm:$0xff] }
 0x2e9   :  { %v94_v47 = vpack.c.bf16 %v83_v46, %v82_v45 }
 0x2ea   :  { %669 = vrcp.f32 %v226_v48 }
 0x2eb   :  { %603 = vmatpush3.bf16.msra.mxu0 %v94_v47  ;;  %v563_v47 = vld [vmem:[%s942_s4] ss:$0 sm:$0xff]  ;;  %s749_s4 = scalar_lea.vmem %s550_s8, 256 }
 0x2ec   :  { %604 = vmatprep.subr.bf16.mxu0 %v784_v4  ;;  %p750_p5 = scmp.ne.s32.totalorder %s550_s8, %s749_s4  ;;  %p755_p7 = scmp.lt.s32.totalorder %s749_s4, %s749_s4 }
 0x2ee   :  { %p756_p8 = por %p755_p7, %p754_p6 }
 0x2f0   :  { %v668_v49 = vpop.eup %667  ;;  %p757_p9 = pnand %p756_p8, %p750_p5 }
 0x2f4   :  { %v670_v53 = vpop.eup %669 }
 0x32e   :  { %v265_v50 = vpop.f32.mrb[4].mxu1 }
 0x32f   :  { %v274_v51 = vmul.f32 %v668_v49, %v265_v50  ;;  %v624_v52 = vpop.f32.mrb[5].mxu1 }
 0x330   :  { %v268_v54 = vpop.f32.mrb[6].mxu1 }
 0x331   :  { %v276_v55 = vmax.f32 %v274_v51, 0.0  ;;  %v275_v56 = vmul.f32 %v670_v53, %v268_v54  ;;  %v625_v57 = vpop.f32.mrb[7].mxu1 }
 0x333   :  { %v277_v58 = vmax.f32 %v275_v56, 0.0  ;;  %v279_v59 = vmul.f32 %v276_v55, %v276_v55 }
 0x335   :  { %281 = vadd.xlane.f32.xlu0 %v279_v59  ;;  %v280_v60 = vmul.f32 %v277_v58, %v277_v58  ;;  %v359_v7 = vpack.c.bf16 %v277_v58, %v276_v55 }
 0x337   :  { %283 = vadd.xlane.f32.xlu1 %v280_v60 }
 0x3c2   :  { %v282_v61 = vpop.xlane.xlu0 %281 }
 0x3c3   :  { %v285_v62 = vmax.f32 %v282_v61, 1e-24 }
 0x3c4   :  { %v284_v63 = vpop.xlane.xlu1 %283 }
 0x3c5   :  { %671 = vrsqrt.f32 %v285_v62  ;;  %v286_v0 = vmax.f32 %v284_v63, 1e-24  ;;  %v84_v63 = vld [vmem:[#allocation7 + $0x50] sm:$0xff] }
 0x3c7   :  { %673 = vrsqrt.f32 %v286_v0  ;;  %v85_v0 = vld [vmem:[#allocation7 + $0x58] sm:$0xff] }
 0x3cf   :  { %v672_v1 = vpop.eup %671 }
 0x3d0   :  { %v289_v3 = vmul.f32 %v672_v1, %v276_v55  ;;  %v95_v1 = vpack.c.bf16 %v85_v0, %v84_v63 }
 0x3d1   :  { %v674_v2 = vpop.eup %673 }
 0x3d2   :  { %v290_v5 = vmul.f32 %v674_v2, %v277_v58  ;;  %605 = vmatpush3.bf16.msra.mxu0 %v95_v1  ;;  %v86_v2 = vld [vmem:[#allocation7 + $0x60] sm:$0xff] }
 0x3d3   :  { %606 = vmatprep.subr.bf16.mxu0 %v784_v4 }
 0x3d4   :  { %v291_v6 = vpack.c.bf16 %v290_v5, %v289_v3  ;;  %v87_v3 = vld [vmem:[#allocation7 + $0x68] sm:$0xff] }
 0x3d5   :  { %v96_v5 = vpack.c.bf16 %v87_v3, %v86_v2 }
 0x3d6   :  { %627 = vmatpush3.bf16.xpose.msra.mxu1 %v291_v6 }
 0x3d7   :  { %632 = vmatprep.subr.bf16.mxu1 %v784_v4  ;;  %607 = vmatpush3.bf16.msra.mxu0 %v96_v5 }
 0x3d8   :  { %608 = vmatprep.subr.bf16.mxu0 %v784_v4 }
 0x3dd   :  { %629 = vmatmul.mubr.bf16.vlgmr.msra.gmra.mrb[8].mxu1 %v291_v6  ;;  %v88_v6 = vld [vmem:[#allocation7 + $0x70] sm:$0xff] }
 0x3de   :  { %633 = vmatpush3.bf16.msra.mxu1 %v359_v7  ;;  %634 = vmatprep.mubr.msk.bf16.mxu1 %vm785_vm0, %v784_v4  ;;  %v89_v7 = vld [vmem:[#allocation7 + $0x78] sm:$0xff] }
 0x3df   :  { %644 = vmatprep.subr.bf16.mxu1 %v784_v4 }
 0x4b0   :  { %v326_v9 = vpop.f32.mrb[8].mxu1 }
 0x4b1   :  { %v334_v10 = vmul.f32 %v333_v8, %v326_v9  ;;  %v630_v11 = vpop.f32.mrb[9].mxu1 }
 0x4b2   :  { %v329_v12 = vpop.f32.mrb[10].mxu1 }
 0x4b3   :  { %v335_v13 = vmul.f32 %v333_v8, %v329_v12  ;;  %v631_v15 = vpop.f32.mrb[11].mxu1  ;;  %v336_v16 = vadd.f32 %v334_v10, %v876_v23  ;;  %v97_v8 = vpack.c.bf16 %v89_v7, %v88_v6 }
 0x4b5   :  { %v338_v17 = vsel %vm206_vm3, %v336_v16, -inf  ;;  %v337_v18 = vadd.f32 %v335_v13, %v878_v27  ;;  %609 = vmatpush3.bf16.msra.mxu0 %v97_v8 }
 0x4b6   :  { %339 = vmax.xlane.f32.xlu0 %v338_v17  ;;  %638 = vmatprep.subr.bf16.mxu0 %v784_v4 }
 0x4b7   :  { %v341_v19 = vsel %vm206_vm3, %v337_v18, -inf }
 0x4b8   :  { %342 = vmax.xlane.f32.xlu1 %v341_v19  ;;  %611 = vmatmul.mubr.bf16.vlgmr.msra.gmra.mrb[0].mxu0 %v867_v14 }
 0x4b9   :  { %640 = vmatprep.mubr.msk.bf16.mxu0 %vm785_vm0, %v784_v4 }
 0x543   :  { %v340_v20 = vpop.xlane.xlu0 %339 }
 0x544   :  { %v344_v21 = vsub.f32 %v336_v16, %v340_v20 }
 0x545   :  { %v343_v22 = vpop.xlane.xlu1 %342 }
 0x546   :  { %v346_v24 = vmul.f32 1.442695, %v344_v21  ;;  %v345_v25 = vsub.f32 %v337_v18, %v343_v22  ;;  %v463_v22 = vstv %s567_s29 }
 0x548   :  { %675 = vpow2.f32 %v346_v24  ;;  %v348_v26 = vmul.f32 1.442695, %v345_v25 }
 0x54a   :  { %677 = vpow2.f32 %v348_v26 }
 0x552   :  { %v676_v28 = vpop.eup %675 }
 0x553   :  { %v350_v29 = vsel %vm206_vm3, %v676_v28, 0.0 }
 0x554   :  { %v678_v30 = vpop.eup %677  ;;  %351 = vadd.xlane.f32.xlu0 %v350_v29 }
 0x555   :  { %v353_v31 = vsel %vm206_vm3, %v678_v30, 0.0  ;;  %v358_v32 = vpack.c.bf16 %v678_v30, %v676_v28 }
 0x556   :  { %354 = vadd.xlane.f32.xlu1 %v353_v31 }
 0x557   :  { %635 = vmatmul.mubr.msk.bf16.vlgmr.msra.gmra.mrb[12].mxu1 %vm206_vm3, %v358_v32 }
 0x558   :  { %646 = vmatprep.mubr.msk.bf16.mxu1 %vm785_vm0, %v784_v4 }
 0x58b   :  { %v139_v19 = vpop.f32.mrb[0].mxu0 }
 0x58c   :  { %v612_v20 = vpop.f32.mrb[1].mxu0 }
 0x58d   :  { %v142_v21 = vpop.f32.mrb[2].mxu0 }
 0x58e   :  { %v613_v14 = vpop.f32.mrb[3].mxu0 }
 0x5e1   :  { %v352_v48 = vpop.xlane.xlu0 %351 }
 0x5e2   :  { %v356_v50 = vmax.f32 %v352_v48, 1e-30 }
 0x5e3   :  { %v355_v49 = vpop.xlane.xlu1 %354 }
 0x5e4   :  { %v357_v51 = vmax.f32 %v355_v49, 1e-30  ;;  %679 = vrcp.f32 %v356_v50  ;;  %v140_v50 = vadd.f32 %v563_v47, %v139_v19 }
 0x5e6   :  { %681 = vrcp.f32 %v357_v51 }
 0x5ee   :  { %v680_v52 = vpop.eup %679 }
 0x5f0   :  { %v682_v56 = vpop.eup %681 }
 0x62a   :  { %v397_v53 = vpop.f32.mrb[12].mxu1 }
 0x62b   :  { %v406_v54 = vmul.f32 %v680_v52, %v397_v53  ;;  %v636_v55 = vpop.f32.mrb[13].mxu1 }
 0x62c   :  { %v400_v57 = vpop.f32.mrb[14].mxu1  ;;  %v143_v55 = vadd.f32 %v563_v47, %v142_v21 }
 0x62d   :  { %v407_v58 = vmul.f32 %v682_v56, %v400_v57  ;;  %v637_v59 = vpop.f32.mrb[15].mxu1  ;;  %v409_v60 = vmul.f32 %v406_v54, %v406_v54 }
 0x62f   :  { %v489_v61 = vpack.c.bf16 %v407_v58, %v406_v54  ;;  %411 = vadd.xlane.f32.xlu0 %v409_v60  ;;  %v410_v62 = vmul.f32 %v407_v58, %v407_v58 }
 0x631   :  { %645 = vmatpush3.bf16.msra.mxu1 %v489_v61  ;;  %413 = vadd.xlane.f32.xlu1 %v410_v62 }
 0x6bc   :  { %v412_v9 = vpop.xlane.xlu0 %411 }
 0x6bd   :  { %v415_v10 = vmax.f32 %v412_v9, 1e-24 }
 0x6be   :  { %v414_v11 = vpop.xlane.xlu1 %413 }
 0x6bf   :  { %683 = vrsqrt.f32 %v415_v10  ;;  %v416_v12 = vmax.f32 %v414_v11, 1e-24 }
 0x6c1   :  { %685 = vrsqrt.f32 %v416_v12 }
 0x6c9   :  { %v684_v13 = vpop.eup %683 }
 0x6ca   :  { %v419_v16 = vmul.f32 %v684_v13, %v406_v54 }
 0x6cb   :  { %v686_v15 = vpop.eup %685 }
 0x6cc   :  { %v420_v17 = vmul.f32 %v686_v15, %v407_v58 }
 0x6ce   :  { %v421_v18 = vpack.c.bf16 %v420_v17, %v419_v16 }
 0x6d0   :  { %639 = vmatpush3.bf16.xpose.msra.mxu0 %v421_v18 }
 0x6d7   :  { %641 = vmatmul.mubr.bf16.vlgmr.msra.gmra.mrb[4].mxu0 %v421_v18 }
 0x7aa   :  { %v456_v4 = vpop.f32.mrb[4].mxu0 }
 0x7ab   :  { %v464_v24 = vmul.f32 %v463_v22, %v456_v4  ;;  %v642_v25 = vpop.f32.mrb[5].mxu0 }
 0x7ac   :  { %v459_v26 = vpop.f32.mrb[6].mxu0 }
 0x7ad   :  { %v465_v28 = vmul.f32 %v463_v22, %v459_v26  ;;  %v643_v29 = vpop.f32.mrb[7].mxu0  ;;  %v466_v30 = vadd.f32 %v464_v24, %v876_v23 }
 0x7af   :  { %v468_v31 = vsel %vm206_vm3, %v466_v30, -inf  ;;  %v467_v32 = vadd.f32 %v465_v28, %v878_v27 }
 0x7b0   :  { %469 = vmax.xlane.f32.xlu0 %v468_v31 }
 0x7b1   :  { %v471_v33 = vsel %vm206_vm3, %v467_v32, -inf }
 0x7b2   :  { %472 = vmax.xlane.f32.xlu1 %v471_v33 }
 0x83d   :  { %v470_v34 = vpop.xlane.xlu0 %469 }
 0x83e   :  { %v474_v35 = vsub.f32 %v466_v30, %v470_v34 }
 0x83f   :  { %v473_v36 = vpop.xlane.xlu1 %472 }
 0x840   :  { %v476_v37 = vmul.f32 1.442695, %v474_v35  ;;  %v475_v38 = vsub.f32 %v467_v32, %v473_v36 }
 0x842   :  { %687 = vpow2.f32 %v476_v37  ;;  %v478_v39 = vmul.f32 1.442695, %v475_v38 }
 0x844   :  { %689 = vpow2.f32 %v478_v39 }
 0x84c   :  { %v688_v40 = vpop.eup %687 }
 0x84d   :  { %v480_v41 = vsel %vm206_vm3, %v688_v40, 0.0 }
 0x84e   :  { %v690_v23 = vpop.eup %689  ;;  %481 = vadd.xlane.f32.xlu0 %v480_v41 }
 0x84f   :  { %v483_v42 = vsel %vm206_vm3, %v690_v23, 0.0  ;;  %v488_v27 = vpack.c.bf16 %v690_v23, %v688_v40 }
 0x850   :  { %484 = vadd.xlane.f32.xlu1 %v483_v42 }
 0x851   :  { %647 = vmatmul.mubr.msk.bf16.vlgmr.msra.gmra.mrb[16].mxu1 %vm206_vm3, %v488_v27 }
 0x8db   :  { %v482_v43 = vpop.xlane.xlu0 %481 }
 0x8dc   :  { %v486_v45 = vmax.f32 %v482_v43, 1e-30 }
 0x8dd   :  { %v485_v44 = vpop.xlane.xlu1 %484 }
 0x8de   :  { %v487_v46 = vmax.f32 %v485_v44, 1e-30  ;;  %691 = vrcp.f32 %v486_v45 }
 0x8e0   :  { %693 = vrcp.f32 %v487_v46 }
 0x8e8   :  { %v692_v48 = vpop.eup %691 }
 0x8ea   :  { %v694_v53 = vpop.eup %693 }
 0x924   :  { %v527_v49 = vpop.f32.mrb[16].mxu1 }
 0x925   :  { %v536_v51 = vmul.f32 %v692_v48, %v527_v49  ;;  %v648_v52 = vpop.f32.mrb[17].mxu1 }
 0x926   :  { %v530_v54 = vpop.f32.mrb[18].mxu1 }
 0x927   :  { %v538_v56 = vadd.f32 %v536_v51, %v140_v50  ;;  %v537_v57 = vmul.f32 %v694_v53, %v530_v54  ;;  %v649_v58 = vpop.f32.mrb[19].mxu1 }
 0x929   :  { %v539_v59 = vadd.f32 %v537_v57, %v143_v55  ;;  %v540_v60 = vmax.f32 %v538_v56, 0.0 }
 0x92b   :  { %v541_v61 = vmax.f32 %v539_v59, 0.0  ;;  %542 = vst [vmem:[#allocation9] sm:$0xff] %v540_v60 }
 0x92d   :  { %543 = vst [vmem:[#allocation9 + $0x8] sm:$0xff] %v541_v61 }
 0x92e   :  { %760 = shalt.err (!%p757_p9)
}
 0x92f   :  { %s761_s11 = scalar_lea.hbm %s943_s5, 256 }
 0x930   :  { %p762_p10 = scmp.ne.s32.totalorder %s943_s5, %s761_s11  ;;  %p765_p11 = scmp.lt.u32.totalorder %s761_s11, %s943_s5 }
 0x932   :  { %p767_p12 = pnand %p765_p11, %p762_p10 }
 0x934   :  { %770 = shalt.err (!%p767_p12)
}
 0x935   :  { %555 = dma.vmem_to_hbm [thread:$0]  %s550_s8, 256, %s943_s5, [#allocation4], %s781_s0, %s781_s0, %s782_s13  }
 0x936   :  { %777 = dma.done.wait [#allocation4], 256  }
 0x937   :  { %778 = vsyncadd [#allocation4], 4294967040 }
 0x938   :  { %559 = vsyncpa [#allocation3], 1 }
 0x939   :  { %560 = vsyncpa [#allocation8], 1 }
 0x93a   :  { %561 = vsyncpa [#allocation4], 1 }
 0x93b   :  { %562 = vsyncpa [#allocation5], 1 }

</bundles_post_ra>
